<compile_context>
chip_gen: v5e
topology: v5e:2x2
jax: 0.10.0
libtpu: 0.0.40
codegen_flags: <defaults>
</compile_context>

<pallas_src>
import functools

import jax
import jax.numpy as jnp
from jax.experimental import pallas as pl
from jax.experimental.pallas import tpu as pltpu

SELU_ALPHA = 1.6732632423543772
SELU_SCALE = 1.0507009873554805


def _selu(x):
    # exp() only sees the non-positive branch (avoids inf in the discarded lane).
    neg = SELU_ALPHA * (jnp.exp(jnp.minimum(x, 0.0)) - 1.0)
    return SELU_SCALE * jnp.where(x > 0, x, neg)


# ----------------------------- the kernel ------------------------------------


def mionet_kernel(s0_ref, s1_ref, xt_ref, w_ref, out_ref, *,
                  batch, n_eval, in0, in1, tin, hid, p_out, pad_in):
    f32 = jnp.float32
    h3, p3 = 3 * hid, 3 * p_out
    bj = batch * n_eval

    # --- carve the single pre-packed weight slab (static slices, one load each)
    r = 0
    w0 = w_ref[r:r + pad_in, 0:h3]; r += pad_in          # (pad_in, 3H)
    wr = w_ref[r:r + h3, 0:h3];     r += h3              # (3H, 3H)
    wf = w_ref[r:r + h3, 0:p3];     r += h3              # (3H, 3P)
    bias = w_ref[r:r + 8, :]                             # (8, width) aligned tile
    b0 = bias[0:1, 0:h3]
    br = bias[1:2, 0:h3]
    bf = bias[2:3, 0:p3]

    # --- stack [branch rows ; trunk rows] with block-aligned zero columns -----
    top_parts = [s0_ref[...], s1_ref[...]]
    pad_top = pad_in - in0 - in1
    if pad_top > 0:
        top_parts.append(jnp.zeros((batch, pad_top), f32))
    top = jnp.concatenate(top_parts, axis=1)                          # (B, pad_in)

    bot_parts = [jnp.zeros((bj, in0 + in1), f32), xt_ref[...]]
    pad_bot = pad_in - in0 - in1 - tin
    if pad_bot > 0:
        bot_parts.append(jnp.zeros((bj, pad_bot), f32))
    bot = jnp.concatenate(bot_parts, axis=1)                          # (B*J, pad_in)

    x = jnp.concatenate([top, bot], axis=0)                           # (B+B*J, pad_in)

    # --- ONE fused block-diagonal ResNet: Linear -> SELU -> ResBlock -> Linear
    h = _selu(jnp.dot(x, w0, preferred_element_type=f32) + b0)
    y = _selu(jnp.dot(h, wr, preferred_element_type=f32) + br)
    z = _selu(jnp.dot(y, wr, preferred_element_type=f32) + (br + h))
    res = jnp.dot(z, wf, preferred_element_type=f32) + bf             # (rows, 3P)

    # --- split sub-network outputs and contract -------------------------------
    branch = res[0:batch, :]
    dp = branch[:, 0:p_out] * branch[:, p_out:2 * p_out]              # (B, P)
    trunk = res[batch:batch + bj, 2 * p_out:3 * p_out]                # (B*J, P)
    trunk3 = trunk.reshape(batch, n_eval, p_out)                      # (B, J, P)
    # einsum('bi,bji->bj') as VPU broadcast-multiply + XLU lane reduce (no MXU).
    out = jnp.sum(dp[:, None, :] * trunk3, axis=-1)                   # (B, J)
    out_ref[...] = out.astype(out_ref.dtype)


# --------------------- one-time weight packing (hoisted) ----------------------


def pack_mionet_params(params, input_sizes):
    """Fuse the three ResNets' weights into ONE block-diagonal slab.

    Done once when parameters are created -- the per-call forward path performs
    no concat/zeros/block-diag XLA ops and the kernel needs a single weight DMA.
    Slab rows: [W0 (pad_in) | WR (3H) | WF (3H) | bias block (8)], all offsets
    8-row (sublane-tile) aligned for the config used here.
    """
    p = [params["branch0"], params["branch1"], params["trunk"]]
    in0, in1, tin = input_sizes
    hid = p[0]["wr"].shape[0]
    p_out = p[0]["wf"].shape[1]
    h3, p3 = 3 * hid, 3 * p_out
    width = max(h3, p3)
    pad_in = -(-(in0 + in1 + tin) // 8) * 8
    f32 = jnp.float32

    w0 = jnp.zeros((pad_in, width), f32)
    row = 0
    for i, n_in in enumerate((in0, in1, tin)):
        w0 = w0.at[row:row + n_in, i * hid:(i + 1) * hid].set(p[i]["w0"])
        row += n_in

    wr = jnp.zeros((h3, width), f32)
    wf = jnp.zeros((h3, width), f32)
    bias = jnp.zeros((8, width), f32)
    for i in range(3):
        wr = wr.at[i * hid:(i + 1) * hid, i * hid:(i + 1) * hid].set(p[i]["wr"])
        wf = wf.at[i * hid:(i + 1) * hid, i * p_out:(i + 1) * p_out].set(p[i]["wf"])
        bias = bias.at[0, i * hid:(i + 1) * hid].set(p[i]["b0"][0])
        bias = bias.at[1, i * hid:(i + 1) * hid].set(p[i]["br"][0])
        bias = bias.at[2, i * p_out:(i + 1) * p_out].set(p[i]["bf"][0])

    slab = jnp.concatenate([w0, wr, wf, bias], axis=0)   # (pad_in + 6H + 8, width)
    return {"slab": slab, "in0": in0, "in1": in1, "tin": tin,
            "hid": hid, "p_out": p_out, "pad_in": pad_in}


# ----------------------------- forward wrapper --------------------------------


def mionet_forward(sensors, xt, packed):
    """sensors: tuple of two (B, in_i) arrays; xt: (B, J, trunk_in)."""
    s0, s1 = sensors
    B, J, tin = xt.shape
    assert tin == packed["tin"]
    xt_flat = xt.reshape(B * J, tin)

    kernel = functools.partial(
        mionet_kernel, batch=B, n_eval=J,
        in0=packed["in0"], in1=packed["in1"], tin=tin,
        hid=packed["hid"], p_out=packed["p_out"], pad_in=packed["pad_in"])

    # Single grid point: every operand is tiny and lives whole in VMEM.
    # TODO(synk): at scale, add a "parallel" grid axis over B*J rows with
    # untiled weight specs and a lane-dense output slab (see header note).
    return pl.pallas_call(
        kernel,
        out_shape=jax.ShapeDtypeStruct((B, J), jnp.float32),
        in_specs=[pl.BlockSpec(memory_space=pltpu.MemorySpace.VMEM)] * 4,
        out_specs=pl.BlockSpec(memory_space=pltpu.MemorySpace.VMEM),
    )(s0, s1, xt_flat, packed["slab"])


# ---------------- deterministic parameter init (PyTorch-style uniform) --------


def _init_linear(key, fan_in, fan_out):
    kw, kb = jax.random.split(key)
    bound = 1.0 / (fan_in ** 0.5)
    w = jax.random.uniform(kw, (fan_in, fan_out), jnp.float32, -bound, bound)
    b = jax.random.uniform(kb, (1, fan_out), jnp.float32, -bound, bound)
    return w, b


def init_resnet_params(key, in_size, hidden, out_size):
    k0, kr, kf = jax.random.split(key, 3)
    w0, b0 = _init_linear(k0, in_size, hidden)
    wr, br = _init_linear(kr, hidden, hidden)
    wf, bf = _init_linear(kf, hidden, out_size)
    return {"w0": w0, "b0": b0, "wr": wr, "br": br, "wf": wf, "bf": bf}


# ---------------- pure-JAX reference for correctness checking -----------------


def _reference(sensors, xt, params):
    def resnet(x, p):
        h = _selu(x @ p["w0"] + p["b0"])
        y = _selu(h @ p["wr"] + p["br"])
        z = _selu(y @ p["wr"] + p["br"] + h)
        return z @ p["wf"] + p["bf"]

    dot = resnet(sensors[0], params["branch0"]) * resnet(sensors[1], params["branch1"])
    B, J, tin = xt.shape
    trunk = resnet(xt.reshape(B * J, tin), params["trunk"]).reshape(B, J, -1)
    return jnp.einsum("bi,bji->bj", dot, trunk)


if __name__ == "__main__":
    # MIONET config: n_branches=2, input_sizes=[16, 16, 2],
    # architectures=[[32, 32]]*3, output_size=32, eval_point_imag=8,
    # activation_fn=SELU, model='ResNet'.
    B, J, P, H = 8, 8, 32, 32
    in0, in1, tin = 16, 16, 2

    key = jax.random.PRNGKey(0)
    k = jax.random.split(key, 6)
    s0 = jax.random.normal(k[0], (B, in0), jnp.float32)
    s1 = jax.random.normal(k[1], (B, in1), jnp.float32)
    xt = jax.random.normal(k[2], (B, J, tin), jnp.float32)

    params = {
        "branch0": init_resnet_params(k[3], in0, H, P),
        "branch1": init_resnet_params(k[4], in1, H, P),
        "trunk": init_resnet_params(k[5], tin, H, P),
    }

    # One-time weight fusion/packing (hoisted off the per-call path).
    packed = pack_mionet_params(params, (in0, in1, tin))
    packed["slab"] = jax.block_until_ready(packed["slab"])

    out = mionet_forward((s0, s1), xt, packed)
    out = jax.block_until_ready(out)

    ref = _reference((s0, s1), xt, params)
    assert out.shape == (B, J)
    assert jnp.allclose(out, ref, atol=2e-4, rtol=2e-4), "kernel/reference mismatch"

    print("KERNEL_OK")
</pallas_src>

<mosaic_0001>
module attributes {stable_mosaic.version = 11 : i64} {
  func.func @mionet_kernel(%arg0: memref<8x16xf32, #tpu.memory_space<vmem>>, %arg1: memref<8x16xf32, #tpu.memory_space<vmem>>, %arg2: memref<64x2xf32, #tpu.memory_space<vmem>>, %arg3: memref<240x96xf32, #tpu.memory_space<vmem>>, %arg4: memref<8x8xf32, #tpu.memory_space<vmem>>) attributes {dimension_semantics = [], scalar_prefetch = 0 : i64, scratch_operands = 0 : i64, tpu.core_type = #tpu.core_type<tc>} {
    %c0 = arith.constant 0 : index
    %c0_0 = arith.constant 0 : index
    %0 = vector.load %arg3[%c0, %c0_0] : memref<240x96xf32, #tpu.memory_space<vmem>>, vector<40x96xf32>
    %c40 = arith.constant 40 : index
    %c0_1 = arith.constant 0 : index
    %1 = vector.load %arg3[%c40, %c0_1] : memref<240x96xf32, #tpu.memory_space<vmem>>, vector<96x96xf32>
    %c136 = arith.constant 136 : index
    %c0_2 = arith.constant 0 : index
    %2 = vector.load %arg3[%c136, %c0_2] : memref<240x96xf32, #tpu.memory_space<vmem>>, vector<96x96xf32>
    %c232 = arith.constant 232 : index
    %c0_3 = arith.constant 0 : index
    %3 = vector.load %arg3[%c232, %c0_3] : memref<240x96xf32, #tpu.memory_space<vmem>>, vector<8x96xf32>
    %4 = vector.extract_strided_slice %3 {offsets = [0, 0], sizes = [1, 96], strides = [1, 1]} : vector<8x96xf32> to vector<1x96xf32>
    %5 = vector.extract_strided_slice %3 {offsets = [1, 0], sizes = [1, 96], strides = [1, 1]} : vector<8x96xf32> to vector<1x96xf32>
    %6 = vector.extract_strided_slice %3 {offsets = [2, 0], sizes = [1, 96], strides = [1, 1]} : vector<8x96xf32> to vector<1x96xf32>
    %c0_4 = arith.constant 0 : index
    %c0_5 = arith.constant 0 : index
    %7 = vector.load %arg0[%c0_4, %c0_5] : memref<8x16xf32, #tpu.memory_space<vmem>>, vector<8x16xf32>
    %c0_6 = arith.constant 0 : index
    %c0_7 = arith.constant 0 : index
    %8 = vector.load %arg1[%c0_6, %c0_7] : memref<8x16xf32, #tpu.memory_space<vmem>>, vector<8x16xf32>
    %cst = arith.constant 0.000000e+00 : f32
    %9 = vector.broadcast %cst : f32 to vector<8x8xf32>
    %10 = tpu.concatenate %7, %8, %9 in 1 : vector<8x16xf32>, vector<8x16xf32>, vector<8x8xf32> -> vector<8x40xf32>
    %cst_8 = arith.constant 0.000000e+00 : f32
    %11 = vector.broadcast %cst_8 : f32 to vector<64x32xf32>
    %c0_9 = arith.constant 0 : index
    %c0_10 = arith.constant 0 : index
    %12 = vector.load %arg2[%c0_9, %c0_10] : memref<64x2xf32, #tpu.memory_space<vmem>>, vector<64x2xf32>
    %cst_11 = arith.constant 0.000000e+00 : f32
    %13 = vector.broadcast %cst_11 : f32 to vector<64x6xf32>
    %14 = tpu.concatenate %11, %12, %13 in 1 : vector<64x32xf32>, vector<64x2xf32>, vector<64x6xf32> -> vector<64x40xf32>
    %15 = tpu.concatenate %10, %14 in 0 : vector<8x40xf32>, vector<64x40xf32> -> vector<72x40xf32>
    %cst_12 = arith.constant dense<0.000000e+00> : vector<72x96xf32>
    %16 = tpu.matmul %15, %0, %cst_12 {dimension_numbers = #tpu.dot_dimension_numbers<[1], [0], [0], [1], [0, 0, 1, 1], [], []>} : vector<72x40xf32>, vector<40x96xf32>, vector<72x96xf32> -> vector<72x96xf32>
    %17 = vector.broadcast %4 : vector<1x96xf32> to vector<72x96xf32>
    %18 = arith.addf %16, %17 : vector<72x96xf32>
    %cst_13 = arith.constant 0.000000e+00 : f32
    %19 = vector.broadcast %cst_13 : f32 to vector<72x96xf32>
    %20 = arith.minimumf %18, %19 : vector<72x96xf32>
    %21 = math.exp %20 : vector<72x96xf32>
    %cst_14 = arith.constant 1.000000e+00 : f32
    %22 = vector.broadcast %cst_14 : f32 to vector<72x96xf32>
    %23 = arith.subf %21, %22 : vector<72x96xf32>
    %cst_15 = arith.constant 1.67326319 : f32
    %24 = vector.broadcast %cst_15 : f32 to vector<72x96xf32>
    %25 = arith.mulf %24, %23 : vector<72x96xf32>
    %cst_16 = arith.constant 0.000000e+00 : f32
    %26 = vector.broadcast %cst_16 : f32 to vector<72x96xf32>
    %27 = arith.cmpf ogt, %18, %26 : vector<72x96xf32>
    %28 = arith.select %27, %18, %25 : vector<72x96xi1>, vector<72x96xf32>
    %cst_17 = arith.constant 1.05070102 : f32
    %29 = vector.broadcast %cst_17 : f32 to vector<72x96xf32>
    %30 = arith.mulf %29, %28 : vector<72x96xf32>
    %cst_18 = arith.constant dense<0.000000e+00> : vector<72x96xf32>
    %31 = tpu.matmul %30, %1, %cst_18 {dimension_numbers = #tpu.dot_dimension_numbers<[1], [0], [0], [1], [0, 0, 1, 1], [], []>} : vector<72x96xf32>, vector<96x96xf32>, vector<72x96xf32> -> vector<72x96xf32>
    %32 = vector.broadcast %5 : vector<1x96xf32> to vector<72x96xf32>
    %33 = arith.addf %31, %32 : vector<72x96xf32>
    %cst_19 = arith.constant 0.000000e+00 : f32
    %34 = vector.broadcast %cst_19 : f32 to vector<72x96xf32>
    %35 = arith.minimumf %33, %34 : vector<72x96xf32>
    %36 = math.exp %35 : vector<72x96xf32>
    %cst_20 = arith.constant 1.000000e+00 : f32
    %37 = vector.broadcast %cst_20 : f32 to vector<72x96xf32>
    %38 = arith.subf %36, %37 : vector<72x96xf32>
    %cst_21 = arith.constant 1.67326319 : f32
    %39 = vector.broadcast %cst_21 : f32 to vector<72x96xf32>
    %40 = arith.mulf %39, %38 : vector<72x96xf32>
    %cst_22 = arith.constant 0.000000e+00 : f32
    %41 = vector.broadcast %cst_22 : f32 to vector<72x96xf32>
    %42 = arith.cmpf ogt, %33, %41 : vector<72x96xf32>
    %43 = arith.select %42, %33, %40 : vector<72x96xi1>, vector<72x96xf32>
    %cst_23 = arith.constant 1.05070102 : f32
    %44 = vector.broadcast %cst_23 : f32 to vector<72x96xf32>
    %45 = arith.mulf %44, %43 : vector<72x96xf32>
    %cst_24 = arith.constant dense<0.000000e+00> : vector<72x96xf32>
    %46 = tpu.matmul %45, %1, %cst_24 {dimension_numbers = #tpu.dot_dimension_numbers<[1], [0], [0], [1], [0, 0, 1, 1], [], []>} : vector<72x96xf32>, vector<96x96xf32>, vector<72x96xf32> -> vector<72x96xf32>
    %47 = vector.broadcast %5 : vector<1x96xf32> to vector<72x96xf32>
    %48 = arith.addf %47, %30 : vector<72x96xf32>
    %49 = arith.addf %46, %48 : vector<72x96xf32>
    %cst_25 = arith.constant 0.000000e+00 : f32
    %50 = vector.broadcast %cst_25 : f32 to vector<72x96xf32>
    %51 = arith.minimumf %49, %50 : vector<72x96xf32>
    %52 = math.exp %51 : vector<72x96xf32>
    %cst_26 = arith.constant 1.000000e+00 : f32
    %53 = vector.broadcast %cst_26 : f32 to vector<72x96xf32>
    %54 = arith.subf %52, %53 : vector<72x96xf32>
    %cst_27 = arith.constant 1.67326319 : f32
    %55 = vector.broadcast %cst_27 : f32 to vector<72x96xf32>
    %56 = arith.mulf %55, %54 : vector<72x96xf32>
    %cst_28 = arith.constant 0.000000e+00 : f32
    %57 = vector.broadcast %cst_28 : f32 to vector<72x96xf32>
    %58 = arith.cmpf ogt, %49, %57 : vector<72x96xf32>
    %59 = arith.select %58, %49, %56 : vector<72x96xi1>, vector<72x96xf32>
    %cst_29 = arith.constant 1.05070102 : f32
    %60 = vector.broadcast %cst_29 : f32 to vector<72x96xf32>
    %61 = arith.mulf %60, %59 : vector<72x96xf32>
    %cst_30 = arith.constant dense<0.000000e+00> : vector<72x96xf32>
    %62 = tpu.matmul %61, %2, %cst_30 {dimension_numbers = #tpu.dot_dimension_numbers<[1], [0], [0], [1], [0, 0, 1, 1], [], []>} : vector<72x96xf32>, vector<96x96xf32>, vector<72x96xf32> -> vector<72x96xf32>
    %63 = vector.broadcast %6 : vector<1x96xf32> to vector<72x96xf32>
    %64 = arith.addf %62, %63 : vector<72x96xf32>
    %65 = vector.extract_strided_slice %64 {offsets = [0, 0], sizes = [8, 96], strides = [1, 1]} : vector<72x96xf32> to vector<8x96xf32>
    %66 = vector.extract_strided_slice %65 {offsets = [0, 0], sizes = [8, 32], strides = [1, 1]} : vector<8x96xf32> to vector<8x32xf32>
    %67 = vector.extract_strided_slice %65 {offsets = [0, 32], sizes = [8, 32], strides = [1, 1]} : vector<8x96xf32> to vector<8x32xf32>
    %68 = arith.mulf %66, %67 : vector<8x32xf32>
    %69 = vector.extract_strided_slice %64 {offsets = [8, 64], sizes = [64, 32], strides = [1, 1]} : vector<72x96xf32> to vector<64x32xf32>
    %70 = vector.shape_cast %69 : vector<64x32xf32> to vector<8x8x32xf32>
    %71 = vector.shape_cast %68 : vector<8x32xf32> to vector<8x1x32xf32>
    %72 = vector.broadcast %71 : vector<8x1x32xf32> to vector<8x8x32xf32>
    %73 = arith.mulf %72, %70 : vector<8x8x32xf32>
    %cst_31 = arith.constant dense<0.000000e+00> : vector<8x8xf32>
    %74 = vector.multi_reduction <add>, %73, %cst_31 [2] : vector<8x8x32xf32> to vector<8x8xf32>
    %c0_32 = arith.constant 0 : index
    %c0_33 = arith.constant 0 : index
    %75 = vector.load %arg4[%c0_32, %c0_33] : memref<8x8xf32, #tpu.memory_space<vmem>>, vector<8x8xf32>
    tpu.vector_store %arg4[%c0_32, %c0_33], %74 {strides = array<i32>} : memref<8x8xf32, #tpu.memory_space<vmem>>, vector<8x8xf32>,
    return
  }
}

</mosaic_0001>

<bundles_post_ra>
// kernel: tpu_custom_call.1
= control target key start
LH: loop header
LB: loop body
LE: loop exit
PB: predicated region body
PF: predicated region fallthrough
CT: control target
= control target key end

     0   :  { %s921_s19 = smov 16   ;;  %s922_s20 = smov 32   ;;  %s1207_s0 = inlined_call_operand.vmem [shape: f32[8,16], index: 0, kind: input, shape index: {}]   ;;  %s1208_s1 = inlined_call_operand.vmem [shape: f32[8,16], index: 1, kind: input, shape index: {}]   ;;  %s1209_s2 = inlined_call_operand.vmem [shape: f32[64,2], index: 2, kind: input, shape index: {}]   ;;  %s1210_s3 = inlined_call_operand.vmem [shape: f32[240,96], index: 3, kind: input, shape index: {}]   ;;  %s1211_s4 = inlined_call_operand.hbm [shape: f32[8,8], index: 4, kind: output, shape index: {}]  }
   0x1   :  { %v49_v0 = vld [vmem:[%s1208_s1] sm:$0xff]  ;;  %v59_v1 = vld [vmem:[%s1209_s2 + $0x8] sm:$0xff]  ;;  %v61_v2 = vld [vmem:[%s1209_s2 + $0x18] sm:$0xff] }
   0x2   :  { %51 = vrot.lane.b32.xlu0 %v49_v0, %s921_s19  ;;  %76 = vrot.lane.b32.xlu1 %v59_v1, %s922_s20  ;;  %v22_v3 = vld [vmem:[%s1210_s3 + $0x20] sm:$0xff]  ;;  %v21_v4 = vld [vmem:[%s1210_s3 + $0x18] sm:$0xff] }
   0x3   :  { %80 = vrot.lane.b32.xlu2 %v61_v2, %s922_s20  ;;  %155 = vmatpush.msra.mxu0 %v22_v3 }
   0x4   :  { %9 = vsyncpa [#allocation3], 0  ;;  %v20_v5 = vld [vmem:[%s1210_s3 + $0x10] sm:$0xff]  ;;  %v58_v6 = vld [vmem:[%s1209_s2] sm:$0xff]  ;;  %vm54_vm0 = vcmask 130048   ;;  %vm56_vm1 = vcmask 261120  }
   0x5   :  { %v60_v7 = vld [vmem:[%s1209_s2 + $0x10] sm:$0xff]  ;;  %156 = vmatpush.msra.mxu0 %v21_v4  ;;  %v62_v8 = vld [vmem:[%s1209_s2 + $0x20] sm:$0xff]  ;;  %v63_v9 = vld [vmem:[%s1209_s2 + $0x28] sm:$0xff]  ;;  %vm116_vm2 = vcmask 326656   ;;  %vm106_vm3 = vcmask 277504   ;;  %vm261_vm5 = vcmask 785408  }
   0x6   :  { %v64_v10 = vld [vmem:[%s1209_s2 + $0x30] sm:$0xff]  ;;  %v65_v11 = vld [vmem:[%s1209_s2 + $0x38] sm:$0xff]  ;;  %v19_v12 = vld [vmem:[%s1210_s3 + $0x8] sm:$0xff]  ;;  %s924_s12 = smov 64   ;;  %s925_s13 = smov [#allocation2]  }
   0x7   :  { %157 = vmatpush.msra.mxu0 %v20_v5  ;;  %v18_v13 = vld [vmem:[%s1210_s3] sm:$0xff]  ;;  %v33_v43 = vld [vmem:[%s1210_s3 + $0x78] sm:$0xff]  ;;  %v32_v44 = vld [vmem:[%s1210_s3 + $0x70] sm:$0xff]  ;;  %s762_s14 = sshll.u32 %s925_s13, 4  ;;  %s764_s17 = sshll.u32 %s1211_s4, 4  ;;  %s763_s14 = int_to_ptr.vmem [resolvable:$true] %s762_s14  ;;  %s765_s17 = int_to_ptr.hbm [resolvable:$true] %s764_s17 }
   0x8   :  { %v48_v14 = vld [vmem:[%s1207_s0] sm:$0xff]  ;;  %v31_v45 = vld [vmem:[%s1210_s3 + $0x68] sm:$0xff]  ;;  %v29_v47 = vld [vmem:[%s1210_s3 + $0x58] sm:$0xff] }
   0x9   :  { %158 = vmatpush.msra.mxu0 %v19_v12  ;;  %v34_v31 = vld [vmem:[%s1210_s3 + $0x80] sm:$0xff]  ;;  %v28_v48 = vld [vmem:[%s1210_s3 + $0x50] sm:$0xff]  ;;  %v27_v49 = vld [vmem:[%s1210_s3 + $0x48] sm:$0xff] }
   0xa   :  { %74 = vrot.lane.b32.xlu0 %v58_v6, %s922_s20  ;;  %78 = vrot.lane.b32.xlu1 %v60_v7, %s922_s20  ;;  %v30_v46 = vld [vmem:[%s1210_s3 + $0x60] sm:$0xff]  ;;  %v25_v51 = vld [vmem:[%s1210_s3 + $0x38] sm:$0xff] }
   0xb   :  { %82 = vrot.lane.b32.xlu2 %v62_v8, %s922_s20  ;;  %159 = vmatpush.msra.mxu0 %v18_v13  ;;  %v26_v50 = vld [vmem:[%s1210_s3 + $0x40] sm:$0xff]  ;;  %v24_v52 = vld [vmem:[%s1210_s3 + $0x30] sm:$0xff]  ;;  %v23_v53 = vld [vmem:[%s1210_s3 + $0x28] sm:$0xff] }
   0xc   :  { %293 = vmatpush.msra.mxu1 %v34_v31  ;;  %445 = vmatpush.msra.mxu2 %v34_v31  ;;  %v1061_v54 = vld [vmem:[%s1210_s3 + $0xe8] sm:$0xff] }
   0xd   :  { %v1064_v55 = vperm.slane %v1061_v54, 0 }
   0xe   :  { %294 = vmatpush.msra.mxu1 %v33_v43  ;;  %446 = vmatpush.msra.mxu2 %v33_v43 }
  0x10   :  { %295 = vmatpush.msra.mxu1 %v32_v44  ;;  %447 = vmatpush.msra.mxu2 %v32_v44 }
  0x12   :  { %84 = vrot.lane.b32.xlu0 %v63_v9, %s922_s20  ;;  %86 = vrot.lane.b32.xlu1 %v64_v10, %s922_s20 }
  0x13   :  { %88 = vrot.lane.b32.xlu2 %v65_v11, %s922_s20  ;;  %296 = vmatpush.msra.mxu1 %v31_v45 }
  0x14   :  { %448 = vmatpush.msra.mxu2 %v31_v45 }
  0x15   :  { %297 = vmatpush.msra.mxu1 %v30_v46 }
  0x16   :  { %449 = vmatpush.msra.mxu2 %v30_v46 }
  0x17   :  { %298 = vmatpush.msra.mxu1 %v29_v47 }
  0x18   :  { %450 = vmatpush.msra.mxu2 %v29_v47 }
  0x19   :  { %299 = vmatpush.msra.mxu1 %v28_v48 }
  0x1a   :  { %451 = vmatpush.msra.mxu2 %v28_v48 }
  0x1b   :  { %300 = vmatpush.msra.mxu1 %v27_v49 }
  0x1c   :  { %452 = vmatpush.msra.mxu2 %v27_v49 }
  0x1d   :  { %301 = vmatpush.msra.mxu1 %v26_v50 }
  0x1e   :  { %453 = vmatpush.msra.mxu2 %v26_v50 }
  0x1f   :  { %302 = vmatpush.msra.mxu1 %v25_v51 }
  0x20   :  { %454 = vmatpush.msra.mxu2 %v25_v51 }
  0x21   :  { %303 = vmatpush.msra.mxu1 %v24_v52 }
  0x22   :  { %455 = vmatpush.msra.mxu2 %v24_v52 }
  0x23   :  { %304 = vmatpush.msra.mxu1 %v23_v53 }
  0x24   :  { %456 = vmatpush.msra.mxu2 %v23_v53 }
  0x5d   :  { %v81_v27 = vpop.permute.xlu2 %80 }
  0x5e   :  { %v101_v28 = vsel %vm56_vm1, 0.0, %v81_v27 }
  0x5f   :  { %v110_v29 = vsel %vm106_vm3, %v101_v28, 0.0 }
  0x65   :  { %v83_v30 = vpop.permute.xlu2 %82 }
  0x66   :  { %v102_v32 = vsel %vm56_vm1, 0.0, %v83_v30 }
  0x67   :  { %v111_v33 = vsel %vm106_vm3, %v102_v32, 0.0 }
  0x6d   :  { %v89_v40 = vpop.permute.xlu2 %88 }
  0x6e   :  { %v105_v41 = vsel %vm56_vm1, 0.0, %v89_v40 }
  0x6f   :  { %v114_v42 = vsel %vm106_vm3, %v105_v41, 0.0 }
  0x74   :  { %v52_v15 = vpop.permute.xlu0 %51  ;;  %v77_v19 = vpop.permute.xlu1 %76 }
  0x75   :  { %v55_v16 = vsel %vm54_vm0, %v48_v14, %v52_v15  ;;  %v99_v22 = vsel %vm56_vm1, 0.0, %v77_v19 }
  0x76   :  { %v57_v17 = vsel %vm56_vm1, %v55_v16, 0.0  ;;  %v108_v23 = vsel %vm106_vm3, %v99_v22, 0.0 }
  0x77   :  { %773 = vmatmul.msk.f32.vlgmr.msra.gmra.mxu0 %vm116_vm2, %v57_v17 }
  0x7c   :  { %v75_v18 = vpop.permute.xlu0 %74  ;;  %v79_v24 = vpop.permute.xlu1 %78 }
  0x7d   :  { %v98_v20 = vsel %vm56_vm1, 0.0, %v75_v18  ;;  %v100_v25 = vsel %vm56_vm1, 0.0, %v79_v24 }
  0x7e   :  { %v107_v21 = vsel %vm106_vm3, %v98_v20, 0.0  ;;  %v109_v26 = vsel %vm106_vm3, %v100_v25, 0.0 }
  0x7f   :  { %774 = vmatmul.msk.f32.gmra.mxu0 %vm116_vm2, %v107_v21 }
  0x84   :  { %v85_v34 = vpop.permute.xlu0 %84  ;;  %v87_v37 = vpop.permute.xlu1 %86 }
  0x85   :  { %v103_v35 = vsel %vm56_vm1, 0.0, %v85_v34  ;;  %v104_v38 = vsel %vm56_vm1, 0.0, %v87_v37 }
  0x86   :  { %v112_v36 = vsel %vm106_vm3, %v103_v35, 0.0  ;;  %v113_v39 = vsel %vm106_vm3, %v104_v38, 0.0 }
  0x87   :  { %775 = vmatmul.msk.f32.gmra.mxu0 %vm116_vm2, %v108_v23 }
  0x8f   :  { %776 = vmatmul.msk.f32.gmra.mxu0 %vm116_vm2, %v109_v26 }
  0x97   :  { %777 = vmatmul.msk.f32.gmra.mxu0 %vm116_vm2, %v110_v29 }
  0x9f   :  { %778 = vmatmul.msk.f32.gmra.mxu0 %vm116_vm2, %v111_v33 }
  0xa7   :  { %779 = vmatmul.msk.f32.gmra.mxu0 %vm116_vm2, %v112_v36 }
  0xaf   :  { %780 = vmatmul.msk.f32.gmra.mxu0 %vm116_vm2, %v113_v39 }
  0xb7   :  { %781 = vmatmul.msk.f32.gmra.mxu0 %vm116_vm2, %v114_v42 }
  0xf4   :  { %v161_v56 = vpop.f32.mrf.mxu0 }
  0xf5   :  { %v162_v57 = vadd.f32 %v161_v56, %v1064_v55 }
  0xf7   :  { %v188_v58 = vmin.f32 %v162_v57, 0.0  ;;  %vm233_vm4 = vcmp.gt.f32.partialorder %v162_v57, 0.0 }
  0xf9   :  { %v197_v59 = vmul.f32 1.442695, %v188_v58 }
  0xfb   :  { %841 = vpow2.f32 %v197_v59 }
  0xfc   :  { %v164_v60 = vpop.f32.mrf.mxu0 }
  0xfd   :  { %v165_v61 = vadd.f32 %v164_v60, %v1064_v55 }
  0xff   :  { %v189_v62 = vmin.f32 %v165_v61, 0.0  ;;  %vm234_vm6 = vcmp.gt.f32.partialorder %v165_v61, 0.0 }
 0x101   :  { %v842_v63 = vpop.eup %841  ;;  %v199_v0 = vmul.f32 1.442695, %v189_v62 }
 0x102   :  { %v782_v1 = vadd.f32 -1.0, %v842_v63 }
 0x103   :  { %843 = vpow2.f32 %v199_v0 }
 0x104   :  { %v224_v2 = vmul.f32 1.6732632, %v782_v1  ;;  %v167_v3 = vpop.f32.mrf.mxu0 }
 0x105   :  { %v168_v4 = vadd.f32 %v167_v3, %v1064_v55 }
 0x106   :  { %v242_v5 = vsel %vm233_vm4, %v162_v57, %v224_v2 }
 0x107   :  { %v190_v6 = vmin.f32 %v168_v4, 0.0  ;;  %v1069_v7 = vmul.f32 1.050701, %v242_v5  ;;  %vm235_vm7 = vcmp.gt.f32.partialorder %v168_v4, 0.0 }
 0x109   :  { %v844_v8 = vpop.eup %843  ;;  %v201_v9 = vmul.f32 1.442695, %v190_v6  ;;  %791 = vmatmul.msk.f32.vlgmr.msra.gmra.mxu1 %vm261_vm5, %v1069_v7 }
 0x10a   :  { %v783_v10 = vadd.f32 -1.0, %v844_v8 }
 0x10b   :  { %845 = vpow2.f32 %v201_v9 }
 0x10c   :  { %v225_v11 = vmul.f32 1.6732632, %v783_v10  ;;  %v170_v12 = vpop.f32.mrf.mxu0 }
 0x10d   :  { %v171_v13 = vadd.f32 %v170_v12, %v1064_v55 }
 0x10e   :  { %v243_v14 = vsel %vm234_vm6, %v165_v61, %v225_v11  ;;  %v1112_v11 = vperm.slane %v1061_v54, 1 }
 0x10f   :  { %v191_v15 = vmin.f32 %v171_v13, 0.0  ;;  %v1074_v16 = vmul.f32 1.050701, %v243_v14  ;;  %vm236_vm8 = vcmp.gt.f32.partialorder %v171_v13, 0.0 }
 0x111   :  { %v846_v17 = vpop.eup %845  ;;  %v203_v18 = vmul.f32 1.442695, %v191_v15  ;;  %792 = vmatmul.msk.f32.gmra.mxu1 %vm261_vm5, %v1074_v16 }
 0x112   :  { %v784_v19 = vadd.f32 -1.0, %v846_v17 }
 0x113   :  { %847 = vpow2.f32 %v203_v18 }
 0x114   :  { %v226_v20 = vmul.f32 1.6732632, %v784_v19  ;;  %v173_v21 = vpop.f32.mrf.mxu0 }
 0x115   :  { %v174_v22 = vadd.f32 %v173_v21, %v1064_v55 }
 0x116   :  { %v244_v23 = vsel %vm235_vm7, %v168_v4, %v226_v20 }
 0x117   :  { %v192_v24 = vmin.f32 %v174_v22, 0.0  ;;  %v1079_v25 = vmul.f32 1.050701, %v244_v23  ;;  %vm237_vm9 = vcmp.gt.f32.partialorder %v174_v22, 0.0 }
 0x119   :  { %v848_v26 = vpop.eup %847  ;;  %v205_v27 = vmul.f32 1.442695, %v192_v24  ;;  %793 = vmatmul.msk.f32.gmra.mxu1 %vm261_vm5, %v1079_v25 }
 0x11a   :  { %v785_v28 = vadd.f32 -1.0, %v848_v26 }
 0x11b   :  { %849 = vpow2.f32 %v205_v27 }
 0x11c   :  { %v227_v29 = vmul.f32 1.6732632, %v785_v28  ;;  %v176_v30 = vpop.f32.mrf.mxu0 }
 0x11d   :  { %v177_v31 = vadd.f32 %v176_v30, %v1064_v55 }
 0x11e   :  { %v245_v32 = vsel %vm236_vm8, %v171_v13, %v227_v29 }
 0x11f   :  { %v193_v33 = vmin.f32 %v177_v31, 0.0  ;;  %v1084_v34 = vmul.f32 1.050701, %v245_v32  ;;  %vm238_vm10 = vcmp.gt.f32.partialorder %v177_v31, 0.0 }
 0x121   :  { %v850_v35 = vpop.eup %849  ;;  %v207_v36 = vmul.f32 1.442695, %v193_v33  ;;  %794 = vmatmul.msk.f32.gmra.mxu1 %vm261_vm5, %v1084_v34 }
 0x122   :  { %v786_v37 = vadd.f32 -1.0, %v850_v35 }
 0x123   :  { %851 = vpow2.f32 %v207_v36 }
 0x124   :  { %v228_v38 = vmul.f32 1.6732632, %v786_v37  ;;  %v179_v39 = vpop.f32.mrf.mxu0 }
 0x125   :  { %v180_v40 = vadd.f32 %v179_v39, %v1064_v55 }
 0x126   :  { %v246_v41 = vsel %vm237_vm9, %v174_v22, %v228_v38 }
 0x127   :  { %v194_v42 = vmin.f32 %v180_v40, 0.0  ;;  %v1089_v43 = vmul.f32 1.050701, %v246_v41  ;;  %vm239_vm11 = vcmp.gt.f32.partialorder %v180_v40, 0.0 }
 0x129   :  { %v852_v44 = vpop.eup %851  ;;  %v209_v45 = vmul.f32 1.442695, %v194_v42  ;;  %795 = vmatmul.msk.f32.gmra.mxu1 %vm261_vm5, %v1089_v43 }
 0x12a   :  { %v787_v46 = vadd.f32 -1.0, %v852_v44 }
 0x12b   :  { %853 = vpow2.f32 %v209_v45 }
 0x12c   :  { %v229_v47 = vmul.f32 1.6732632, %v787_v46  ;;  %v182_v48 = vpop.f32.mrf.mxu0 }
 0x12d   :  { %v183_v49 = vadd.f32 %v182_v48, %v1064_v55 }
 0x12e   :  { %v247_v50 = vsel %vm238_vm10, %v177_v31, %v229_v47 }
 0x12f   :  { %v195_v51 = vmin.f32 %v183_v49, 0.0  ;;  %v1094_v52 = vmul.f32 1.050701, %v247_v50  ;;  %vm240_vm12 = vcmp.gt.f32.partialorder %v183_v49, 0.0 }
 0x131   :  { %v854_v53 = vpop.eup %853  ;;  %v211_v56 = vmul.f32 1.442695, %v195_v51  ;;  %796 = vmatmul.msk.f32.gmra.mxu1 %vm261_vm5, %v1094_v52 }
 0x132   :  { %v788_v57 = vadd.f32 -1.0, %v854_v53 }
 0x133   :  { %855 = vpow2.f32 %v211_v56 }
 0x134   :  { %v230_v58 = vmul.f32 1.6732632, %v788_v57  ;;  %v185_v59 = vpop.f32.mrf.mxu0 }
 0x135   :  { %v186_v60 = vadd.f32 %v185_v59, %v1064_v55 }
 0x136   :  { %v248_v61 = vsel %vm239_vm11, %v180_v40, %v230_v58 }
 0x137   :  { %v196_v62 = vmin.f32 %v186_v60, 0.0  ;;  %v1099_v63 = vmul.f32 1.050701, %v248_v61  ;;  %vm241_vm13 = vcmp.gt.f32.partialorder %v186_v60, 0.0 }
 0x139   :  { %v856_v0 = vpop.eup %855  ;;  %v213_v1 = vmul.f32 1.442695, %v196_v62  ;;  %797 = vmatmul.msk.f32.gmra.mxu1 %vm261_vm5, %v1099_v63 }
 0x13a   :  { %v789_v2 = vadd.f32 -1.0, %v856_v0 }
 0x13b   :  { %857 = vpow2.f32 %v213_v1 }
 0x13c   :  { %v231_v3 = vmul.f32 1.6732632, %v789_v2 }
 0x13e   :  { %v249_v4 = vsel %vm240_vm12, %v183_v49, %v231_v3 }
 0x13f   :  { %v1103_v5 = vmul.f32 1.050701, %v249_v4 }
 0x141   :  { %v858_v6 = vpop.eup %857  ;;  %798 = vmatmul.msk.f32.gmra.mxu1 %vm261_vm5, %v1103_v5 }
 0x142   :  { %v790_v55 = vadd.f32 -1.0, %v858_v6 }
 0x144   :  { %v232_v8 = vmul.f32 1.6732632, %v790_v55 }
 0x146   :  { %v250_v9 = vsel %vm241_vm13, %v186_v60, %v232_v8 }
 0x147   :  { %v1107_v10 = vmul.f32 1.050701, %v250_v9 }
 0x149   :  { %799 = vmatmul.msk.f32.gmra.mxu1 %vm261_vm5, %v1107_v10 }
 0x186   :  { %v306_v12 = vpop.f32.mrf.mxu1 }
 0x187   :  { %v307_v13 = vadd.f32 %v306_v12, %v1112_v11 }
 0x189   :  { %v333_v14 = vmin.f32 %v307_v13, 0.0  ;;  %vm378_vm14 = vcmp.gt.f32.partialorder %v307_v13, 0.0 }
 0x18b   :  { %v342_v15 = vmul.f32 1.442695, %v333_v14 }
 0x18d   :  { %859 = vpow2.f32 %v342_v15 }
 0x18e   :  { %v309_v17 = vpop.f32.mrf.mxu1 }
 0x18f   :  { %v310_v18 = vadd.f32 %v309_v17, %v1112_v11 }
 0x191   :  { %v334_v19 = vmin.f32 %v310_v18, 0.0  ;;  %vm379_vm15 = vcmp.gt.f32.partialorder %v310_v18, 0.0 }
 0x193   :  { %v860_v20 = vpop.eup %859  ;;  %v344_v21 = vmul.f32 1.442695, %v334_v19 }
 0x194   :  { %v800_v22 = vadd.f32 -1.0, %v860_v20 }
 0x195   :  { %861 = vpow2.f32 %v344_v21 }
 0x196   :  { %v369_v23 = vmul.f32 1.6732632, %v800_v22  ;;  %v312_v24 = vpop.f32.mrf.mxu1 }
 0x197   :  { %v313_v26 = vadd.f32 %v312_v24, %v1112_v11 }
 0x198   :  { %v387_v27 = vsel %vm378_vm14, %v307_v13, %v369_v23  ;;  %v46_v13 = vld [vmem:[%s1210_s3 + $0xe0] sm:$0xff] }
 0x199   :  { %v335_v28 = vmin.f32 %v313_v26, 0.0  ;;  %v396_v29 = vmul.f32 1.050701, %v387_v27  ;;  %vm380_vm0 = vcmp.gt.f32.partialorder %v313_v26, 0.0  ;;  %589 = vmatpush.msra.mxu3 %v46_v13 }
 0x19b   :  { %v862_v30 = vpop.eup %861  ;;  %v346_v31 = vmul.f32 1.442695, %v335_v28  ;;  %809 = vmatmul.msk.f32.vlgmr.msra.gmra.mxu2 %vm261_vm5, %v396_v29 }
 0x19c   :  { %v801_v32 = vadd.f32 -1.0, %v862_v30 }
 0x19d   :  { %863 = vpow2.f32 %v346_v31 }
 0x19e   :  { %v370_v33 = vmul.f32 1.6732632, %v801_v32  ;;  %v315_v35 = vpop.f32.mrf.mxu1 }
 0x19f   :  { %v316_v36 = vadd.f32 %v315_v35, %v1112_v11 }
 0x1a0   :  { %v388_v37 = vsel %vm379_vm15, %v310_v18, %v370_v33 }
 0x1a1   :  { %v336_v38 = vmin.f32 %v316_v36, 0.0  ;;  %v397_v39 = vmul.f32 1.050701, %v388_v37  ;;  %vm381_vm2 = vcmp.gt.f32.partialorder %v316_v36, 0.0 }
 0x1a3   :  { %v864_v40 = vpop.eup %863  ;;  %v348_v41 = vmul.f32 1.442695, %v336_v38  ;;  %810 = vmatmul.msk.f32.gmra.mxu2 %vm261_vm5, %v397_v39 }
 0x1a4   :  { %v802_v42 = vadd.f32 -1.0, %v864_v40 }
 0x1a5   :  { %865 = vpow2.f32 %v348_v41 }
 0x1a6   :  { %v371_v44 = vmul.f32 1.6732632, %v802_v42  ;;  %v318_v45 = vpop.f32.mrf.mxu1 }
 0x1a7   :  { %v319_v46 = vadd.f32 %v318_v45, %v1112_v11  ;;  %v45_v45 = vld [vmem:[%s1210_s3 + $0xd8] sm:$0xff] }
 0x1a8   :  { %v389_v47 = vsel %vm380_vm0, %v313_v26, %v371_v44  ;;  %590 = vmatpush.msra.mxu3 %v45_v45 }
 0x1a9   :  { %v337_v48 = vmin.f32 %v319_v46, 0.0  ;;  %v398_v49 = vmul.f32 1.050701, %v389_v47  ;;  %vm382_vm3 = vcmp.gt.f32.partialorder %v319_v46, 0.0  ;;  %v43_v47 = vld [vmem:[%s1210_s3 + $0xc8] sm:$0xff] }
 0x1ab   :  { %v866_v50 = vpop.eup %865  ;;  %v350_v51 = vmul.f32 1.442695, %v337_v48  ;;  %811 = vmatmul.msk.f32.gmra.mxu2 %vm261_vm5, %v398_v49  ;;  %v42_v48 = vld [vmem:[%s1210_s3 + $0xc0] sm:$0xff]  ;;  %v41_v49 = vld [vmem:[%s1210_s3 + $0xb8] sm:$0xff] }
 0x1ac   :  { %v803_v53 = vadd.f32 -1.0, %v866_v50  ;;  %v40_v50 = vld [vmem:[%s1210_s3 + $0xb0] sm:$0xff] }
 0x1ad   :  { %867 = vpow2.f32 %v350_v51  ;;  %v39_v51 = vld [vmem:[%s1210_s3 + $0xa8] sm:$0xff] }
 0x1ae   :  { %v372_v56 = vmul.f32 1.6732632, %v803_v53  ;;  %v321_v57 = vpop.f32.mrf.mxu1  ;;  %v38_v53 = vld [vmem:[%s1210_s3 + $0xa0] sm:$0xff] }
 0x1af   :  { %v322_v58 = vadd.f32 %v321_v57, %v1112_v11  ;;  %v36_v57 = vld [vmem:[%s1210_s3 + $0x90] sm:$0xff] }
 0x1b0   :  { %v390_v59 = vsel %vm381_vm2, %v316_v36, %v372_v56  ;;  %v37_v56 = vld [vmem:[%s1210_s3 + $0x98] sm:$0xff] }
 0x1b1   :  { %v338_v60 = vmin.f32 %v322_v58, 0.0  ;;  %v399_v61 = vmul.f32 1.050701, %v390_v59  ;;  %vm383_vm4 = vcmp.gt.f32.partialorder %v322_v58, 0.0  ;;  %v405_v59 = vadd.f32 %v1112_v11, %v1069_v7 }
 0x1b3   :  { %v868_v62 = vpop.eup %867  ;;  %v352_v0 = vmul.f32 1.442695, %v338_v60  ;;  %812 = vmatmul.msk.f32.gmra.mxu2 %vm261_vm5, %v399_v61 }
 0x1b4   :  { %v804_v1 = vadd.f32 -1.0, %v868_v62 }
 0x1b5   :  { %869 = vpow2.f32 %v352_v0 }
 0x1b6   :  { %v373_v2 = vmul.f32 1.6732632, %v804_v1  ;;  %v324_v3 = vpop.f32.mrf.mxu1  ;;  %v406_v1 = vadd.f32 %v1112_v11, %v1074_v16 }
 0x1b7   :  { %v325_v4 = vadd.f32 %v324_v3, %v1112_v11 }
 0x1b8   :  { %v391_v6 = vsel %vm382_vm3, %v319_v46, %v373_v2  ;;  %v44_v46 = vld [vmem:[%s1210_s3 + $0xd0] sm:$0xff]  ;;  %vm742_vm3 = vcmask 1042434  }
 0x1b9   :  { %v339_v55 = vmin.f32 %v325_v4, 0.0  ;;  %v400_v8 = vmul.f32 1.050701, %v391_v6  ;;  %vm384_vm6 = vcmp.gt.f32.partialorder %v325_v4, 0.0  ;;  %591 = vmatpush.msra.mxu3 %v44_v46 }
 0x1bb   :  { %v870_v9 = vpop.eup %869  ;;  %v354_v12 = vmul.f32 1.442695, %v339_v55  ;;  %813 = vmatmul.msk.f32.gmra.mxu2 %vm261_vm5, %v400_v8  ;;  %592 = vmatpush.msra.mxu3 %v43_v47 }
 0x1bc   :  { %v805_v14 = vadd.f32 -1.0, %v870_v9  ;;  %v407_v9 = vadd.f32 %v1112_v11, %v1079_v25 }
 0x1bd   :  { %871 = vpow2.f32 %v354_v12  ;;  %593 = vmatpush.msra.mxu3 %v42_v48 }
 0x1be   :  { %v374_v15 = vmul.f32 1.6732632, %v805_v14  ;;  %v327_v17 = vpop.f32.mrf.mxu1 }
 0x1bf   :  { %v328_v18 = vadd.f32 %v327_v17, %v1112_v11  ;;  %594 = vmatpush.msra.mxu3 %v41_v49 }
 0x1c0   :  { %v392_v19 = vsel %vm383_vm4, %v322_v58, %v374_v15  ;;  %v35_v58 = vld [vmem:[%s1210_s3 + $0x88] sm:$0xff]  ;;  %s923_s3 = smov 96   ;;  %vm744_vm4 = vcmask 1043459  }
 0x1c1   :  { %v340_v20 = vmin.f32 %v328_v18, 0.0  ;;  %v401_v21 = vmul.f32 1.050701, %v392_v19  ;;  %vm385_vm7 = vcmp.gt.f32.partialorder %v328_v18, 0.0  ;;  %595 = vmatpush.msra.mxu3 %v40_v50  ;;  %v411_v50 = vadd.f32 %v1112_v11, %v1099_v63 }
 0x1c3   :  { %v872_v22 = vpop.eup %871  ;;  %v356_v23 = vmul.f32 1.442695, %v340_v20  ;;  %814 = vmatmul.msk.f32.gmra.mxu2 %vm261_vm5, %v401_v21  ;;  %596 = vmatpush.msra.mxu3 %v39_v51  ;;  %v408_v20 = vadd.f32 %v1112_v11, %v1084_v34 }
 0x1c4   :  { %v806_v24 = vadd.f32 -1.0, %v872_v22 }
 0x1c5   :  { %873 = vpow2.f32 %v356_v23  ;;  %597 = vmatpush.msra.mxu3 %v38_v53 }
 0x1c6   :  { %v375_v26 = vmul.f32 1.6732632, %v806_v24  ;;  %v330_v27 = vpop.f32.mrf.mxu1 }
 0x1c7   :  { %v331_v28 = vadd.f32 %v330_v27, %v1112_v11  ;;  %598 = vmatpush.msra.mxu3 %v37_v56 }
 0x1c8   :  { %v393_v29 = vsel %vm384_vm6, %v325_v4, %v375_v26  ;;  %vm748_vm6 = vcmask 1045509  }
 0x1c9   :  { %v341_v30 = vmin.f32 %v331_v28, 0.0  ;;  %v402_v31 = vmul.f32 1.050701, %v393_v29  ;;  %vm386_vm8 = vcmp.gt.f32.partialorder %v331_v28, 0.0  ;;  %599 = vmatpush.msra.mxu3 %v36_v57 }
 0x1cb   :  { %v874_v32 = vpop.eup %873  ;;  %v358_v33 = vmul.f32 1.442695, %v341_v30  ;;  %815 = vmatmul.msk.f32.gmra.mxu2 %vm261_vm5, %v402_v31  ;;  %600 = vmatpush.msra.mxu3 %v35_v58  ;;  %v409_v30 = vadd.f32 %v1112_v11, %v1089_v43 }
 0x1cc   :  { %v807_v35 = vadd.f32 -1.0, %v874_v32 }
 0x1cd   :  { %875 = vpow2.f32 %v358_v33 }
 0x1ce   :  { %v376_v36 = vmul.f32 1.6732632, %v807_v35 }
 0x1d0   :  { %v394_v37 = vsel %vm385_vm7, %v328_v18, %v376_v36  ;;  %vm750_vm7 = vcmask 1046534  }
 0x1d1   :  { %v403_v38 = vmul.f32 1.050701, %v394_v37 }
 0x1d3   :  { %v876_v39 = vpop.eup %875  ;;  %816 = vmatmul.msk.f32.gmra.mxu2 %vm261_vm5, %v403_v38 }
 0x1d4   :  { %v808_v40 = vadd.f32 -1.0, %v876_v39 }
 0x1d6   :  { %v377_v41 = vmul.f32 1.6732632, %v808_v40  ;;  %v410_v40 = vadd.f32 %v1112_v11, %v1094_v52 }
 0x1d8   :  { %v395_v42 = vsel %vm386_vm8, %v331_v28, %v377_v41  ;;  %vm752_vm8 = vcmask 1047559  }
 0x1d9   :  { %v404_v44 = vmul.f32 1.050701, %v395_v42 }
 0x1db   :  { %817 = vmatmul.msk.f32.gmra.mxu2 %vm261_vm5, %v404_v44 }
 0x21e   :  { %v458_v60 = vpop.f32.mrf.mxu2 }
 0x21f   :  { %v459_v61 = vadd.f32 %v458_v60, %v405_v59 }
 0x221   :  { %v485_v62 = vmin.f32 %v459_v61, 0.0  ;;  %vm530_vm9 = vcmp.gt.f32.partialorder %v459_v61, 0.0 }
 0x223   :  { %v494_v0 = vmul.f32 1.442695, %v485_v62  ;;  %v412_v62 = vadd.f32 %v1112_v11, %v1103_v5 }
 0x225   :  { %877 = vpow2.f32 %v494_v0 }
 0x226   :  { %v461_v2 = vpop.f32.mrf.mxu2 }
 0x227   :  { %v462_v3 = vadd.f32 %v461_v2, %v406_v1 }
 0x229   :  { %v486_v4 = vmin.f32 %v462_v3, 0.0  ;;  %vm531_vm10 = vcmp.gt.f32.partialorder %v462_v3, 0.0 }
 0x22b   :  { %v878_v6 = vpop.eup %877  ;;  %v496_v55 = vmul.f32 1.442695, %v486_v4 }
 0x22c   :  { %v818_v8 = vadd.f32 -1.0, %v878_v6 }
 0x22d   :  { %879 = vpow2.f32 %v496_v55 }
 0x22e   :  { %v521_v12 = vmul.f32 1.6732632, %v818_v8  ;;  %v464_v7 = vpop.f32.mrf.mxu2 }
 0x22f   :  { %v465_v13 = vadd.f32 %v464_v7, %v407_v9  ;;  %v413_v9 = vadd.f32 %v1112_v11, %v1107_v10 }
 0x230   :  { %v539_v14 = vsel %vm530_vm9, %v459_v61, %v521_v12  ;;  %vm755_vm9 = vcmask 64512  }
 0x231   :  { %v487_v15 = vmin.f32 %v465_v13, 0.0  ;;  %v548_v17 = vmul.f32 1.050701, %v539_v14  ;;  %vm532_vm11 = vcmp.gt.f32.partialorder %v465_v13, 0.0 }
 0x233   :  { %v880_v18 = vpop.eup %879  ;;  %v498_v19 = vmul.f32 1.442695, %v487_v15  ;;  %827 = vmatmul.msk.f32.vlgmr.msra.gmra.mxu3 %vm261_vm5, %v548_v17 }
 0x234   :  { %v819_v16 = vadd.f32 -1.0, %v880_v18 }
 0x235   :  { %881 = vpow2.f32 %v498_v19 }
 0x236   :  { %v522_v21 = vmul.f32 1.6732632, %v819_v16  ;;  %v467_v22 = vpop.f32.mrf.mxu2 }
 0x237   :  { %v468_v25 = vadd.f32 %v467_v22, %v408_v20 }
 0x238   :  { %v540_v23 = vsel %vm531_vm10, %v462_v3, %v522_v21 }
 0x239   :  { %v488_v24 = vmin.f32 %v468_v25, 0.0  ;;  %v549_v26 = vmul.f32 1.050701, %v540_v23  ;;  %vm533_vm12 = vcmp.gt.f32.partialorder %v468_v25, 0.0 }
 0x23b   :  { %v882_v27 = vpop.eup %881  ;;  %v500_v28 = vmul.f32 1.442695, %v488_v24  ;;  %828 = vmatmul.msk.f32.gmra.mxu3 %vm261_vm5, %v549_v26  ;;  %v557_v24 = vperm.slane %v1061_v54, 2 }
 0x23c   :  { %v820_v29 = vadd.f32 -1.0, %v882_v27 }
 0x23d   :  { %883 = vpow2.f32 %v500_v28 }
 0x23e   :  { %v523_v31 = vmul.f32 1.6732632, %v820_v29  ;;  %v470_v32 = vpop.f32.mrf.mxu2 }
 0x23f   :  { %v471_v34 = vadd.f32 %v470_v32, %v409_v30 }
 0x240   :  { %v541_v33 = vsel %vm532_vm11, %v465_v13, %v523_v31 }
 0x241   :  { %v489_v35 = vmin.f32 %v471_v34, 0.0  ;;  %v550_v36 = vmul.f32 1.050701, %v541_v33  ;;  %vm534_vm13 = vcmp.gt.f32.partialorder %v471_v34, 0.0 }
 0x243   :  { %v884_v37 = vpop.eup %883  ;;  %v502_v38 = vmul.f32 1.442695, %v489_v35  ;;  %829 = vmatmul.msk.f32.gmra.mxu3 %vm261_vm5, %v550_v36 }
 0x244   :  { %v821_v39 = vadd.f32 -1.0, %v884_v37 }
 0x245   :  { %885 = vpow2.f32 %v502_v38 }
 0x246   :  { %v524_v41 = vmul.f32 1.6732632, %v821_v39  ;;  %v473_v42 = vpop.f32.mrf.mxu2 }
 0x247   :  { %v474_v43 = vadd.f32 %v473_v42, %v410_v40 }
 0x248   :  { %v542_v44 = vsel %vm533_vm12, %v468_v25, %v524_v41 }
 0x249   :  { %v490_v45 = vmin.f32 %v474_v43, 0.0  ;;  %v551_v46 = vmul.f32 1.050701, %v542_v44  ;;  %vm535_vm14 = vcmp.gt.f32.partialorder %v474_v43, 0.0 }
 0x24b   :  { %v886_v47 = vpop.eup %885  ;;  %v504_v48 = vmul.f32 1.442695, %v490_v45  ;;  %830 = vmatmul.msk.f32.gmra.mxu3 %vm261_vm5, %v551_v46 }
 0x24c   :  { %v822_v49 = vadd.f32 -1.0, %v886_v47 }
 0x24d   :  { %887 = vpow2.f32 %v504_v48 }
 0x24e   :  { %v525_v51 = vmul.f32 1.6732632, %v822_v49  ;;  %v476_v53 = vpop.f32.mrf.mxu2 }
 0x24f   :  { %v477_v52 = vadd.f32 %v476_v53, %v411_v50 }
 0x250   :  { %v543_v56 = vsel %vm534_vm13, %v471_v34, %v525_v51 }
 0x251   :  { %v491_v57 = vmin.f32 %v477_v52, 0.0  ;;  %v552_v58 = vmul.f32 1.050701, %v543_v56  ;;  %vm536_vm15 = vcmp.gt.f32.partialorder %v477_v52, 0.0 }
 0x253   :  { %v888_v59 = vpop.eup %887  ;;  %v506_v60 = vmul.f32 1.442695, %v491_v57  ;;  %831 = vmatmul.msk.f32.gmra.mxu3 %vm261_vm5, %v552_v58 }
 0x254   :  { %v823_v61 = vadd.f32 -1.0, %v888_v59 }
 0x255   :  { %889 = vpow2.f32 %v506_v60 }
 0x256   :  { %v526_v0 = vmul.f32 1.6732632, %v823_v61  ;;  %v479_v1 = vpop.f32.mrf.mxu2 }
 0x257   :  { %v480_v63 = vadd.f32 %v479_v1, %v412_v62 }
 0x258   :  { %v544_v2 = vsel %vm535_vm14, %v474_v43, %v526_v0 }
 0x259   :  { %v492_v3 = vmin.f32 %v480_v63, 0.0  ;;  %v553_v4 = vmul.f32 1.050701, %v544_v2  ;;  %vm537_vm0 = vcmp.gt.f32.partialorder %v480_v63, 0.0 }
 0x25b   :  { %v890_v6 = vpop.eup %889  ;;  %v508_v55 = vmul.f32 1.442695, %v492_v3  ;;  %832 = vmatmul.msk.f32.gmra.mxu3 %vm261_vm5, %v553_v4 }
 0x25c   :  { %v824_v8 = vadd.f32 -1.0, %v890_v6 }
 0x25d   :  { %891 = vpow2.f32 %v508_v55 }
 0x25e   :  { %v527_v12 = vmul.f32 1.6732632, %v824_v8  ;;  %v482_v7 = vpop.f32.mrf.mxu2 }
 0x25f   :  { %v483_v5 = vadd.f32 %v482_v7, %v413_v9 }
 0x260   :  { %v545_v13 = vsel %vm536_vm15, %v477_v52, %v527_v12 }
 0x261   :  { %v493_v14 = vmin.f32 %v483_v5, 0.0  ;;  %v554_v15 = vmul.f32 1.050701, %v545_v13  ;;  %vm538_vm2 = vcmp.gt.f32.partialorder %v483_v5, 0.0 }
 0x263   :  { %v892_v17 = vpop.eup %891  ;;  %v510_v18 = vmul.f32 1.442695, %v493_v14  ;;  %833 = vmatmul.msk.f32.gmra.mxu3 %vm261_vm5, %v554_v15 }
 0x264   :  { %v825_v19 = vadd.f32 -1.0, %v892_v17 }
 0x265   :  { %893 = vpow2.f32 %v510_v18 }
 0x266   :  { %v528_v16 = vmul.f32 1.6732632, %v825_v19 }
 0x268   :  { %v546_v20 = vsel %vm537_vm0, %v480_v63, %v528_v16 }
 0x269   :  { %v555_v21 = vmul.f32 1.050701, %v546_v20 }
 0x26b   :  { %v894_v22 = vpop.eup %893  ;;  %834 = vmatmul.msk.f32.gmra.mxu3 %vm261_vm5, %v555_v21 }
 0x26c   :  { %v826_v10 = vadd.f32 -1.0, %v894_v22 }
 0x26e   :  { %v529_v11 = vmul.f32 1.6732632, %v826_v10 }
 0x270   :  { %v547_v25 = vsel %vm538_vm2, %v483_v5, %v529_v11 }
 0x271   :  { %v556_v23 = vmul.f32 1.050701, %v547_v25  ;;  %v730_v25 = vlaneseq }
 0x273   :  { %835 = vmatmul.msk.f32.gmra.mxu3 %vm261_vm5, %v556_v23  ;;  %vm740_vm5 = vcmask 1041409  }
 0x2b6   :  { %v602_v26 = vpop.f32.mrf.mxu3 }
 0x2b7   :  { %v603_v27 = vadd.f32 %v602_v26, %v557_v24 }
 0x2b9   :  { %630 = vrot.lane.b32.xlu0 %v603_v27, %s923_s3 }
 0x2be   :  { %v605_v28 = vpop.f32.mrf.mxu3 }
 0x2bf   :  { %v606_v29 = vadd.f32 %v605_v28, %v557_v24 }
 0x2c1   :  { %666 = vrot.lane.b32.xlu1 %v606_v29, %s924_s12 }
 0x2c6   :  { %v608_v30 = vpop.f32.mrf.mxu3 }
 0x2c7   :  { %v609_v31 = vadd.f32 %v608_v30, %v557_v24 }
 0x2c9   :  { %668 = vrot.lane.b32.xlu2 %v609_v31, %s924_s12 }
 0x2ce   :  { %v611_v32 = vpop.f32.mrf.mxu3 }
 0x2cf   :  { %v612_v34 = vadd.f32 %v611_v32, %v557_v24 }
 0x2d1   :  { %670 = vrot.lane.b32.xlu0 %v612_v34, %s924_s12 }
 0x2d6   :  { %v614_v33 = vpop.f32.mrf.mxu3 }
 0x2d7   :  { %v615_v35 = vadd.f32 %v614_v33, %v557_v24 }
 0x2d9   :  { %672 = vrot.lane.b32.xlu1 %v615_v35, %s924_s12 }
 0x2de   :  { %v617_v36 = vpop.f32.mrf.mxu3 }
 0x2df   :  { %v618_v37 = vadd.f32 %v617_v36, %v557_v24 }
 0x2e1   :  { %674 = vrot.lane.b32.xlu2 %v618_v37, %s924_s12 }
 0x2e6   :  { %v620_v54 = vpop.f32.mrf.mxu3 }
 0x2e7   :  { %v621_v38 = vadd.f32 %v620_v54, %v557_v24 }
 0x2e9   :  { %676 = vrot.lane.b32.xlu0 %v621_v38, %s924_s12 }
 0x2ee   :  { %v623_v39 = vpop.f32.mrf.mxu3 }
 0x2ef   :  { %v624_v40 = vadd.f32 %v623_v39, %v557_v24 }
 0x2f1   :  { %678 = vrot.lane.b32.xlu1 %v624_v40, %s924_s12 }
 0x2f6   :  { %v626_v41 = vpop.f32.mrf.mxu3 }
 0x2f7   :  { %v627_v42 = vadd.f32 %v626_v41, %v557_v24  ;;  %v731_v24 = vand.u32 127, %v730_v25 }
 0x2f9   :  { %680 = vrot.lane.b32.xlu2 %v627_v42, %s924_s12 }
 0x323   :  { %v669_v47 = vpop.permute.xlu2 %668 }
 0x32b   :  { %v631_v43 = vpop.permute.xlu0 %630 }
 0x32c   :  { %v633_v44 = vmul.f32 %v631_v43, %v603_v27 }
 0x32e   :  { %v635_v45 = vrot.slane %v633_v44, 1  ;;  %v642_v48 = vperm.slane %v633_v44, 0  ;;  %v638_v56 = vrot.slane %v633_v44, 4  ;;  %v636_v61 = vrot.slane %v633_v44, 2 }
 0x32f   :  { %v637_v2 = vrot.slane %v633_v44, 3  ;;  %v641_v8 = vrot.slane %v633_v44, 7  ;;  %v639_v13 = vrot.slane %v633_v44, 5  ;;  %v640_v19 = vrot.slane %v633_v44, 6 }
 0x330   :  { %v643_v46 = vperm.slane %v635_v45, 0  ;;  %v646_v57 = vperm.slane %v638_v56, 0  ;;  %v644_v62 = vperm.slane %v636_v61, 0 }
 0x331   :  { %v645_v3 = vperm.slane %v637_v2, 0  ;;  %v649_v9 = vperm.slane %v641_v8, 0  ;;  %v647_v14 = vperm.slane %v639_v13, 0  ;;  %v648_v16 = vperm.slane %v640_v19, 0 }
 0x332   :  { %v691_v49 = vmul.f32 %v669_v47, %v643_v46 }
 0x333   :  { %v667_v50 = vpop.permute.xlu1 %666 }
 0x334   :  { %v690_v51 = vmul.f32 %v667_v50, %v642_v48  ;;  %v701_v53 = vsel %vm56_vm1, %v691_v49, 0.0 }
 0x335   :  { %702 = vadd.xlane.f32.xlu1 %v701_v53 }
 0x336   :  { %v698_v52 = vsel %vm56_vm1, %v690_v51, 0.0 }
 0x337   :  { %699 = vadd.xlane.f32.xlu0 %v698_v52 }
 0x33b   :  { %v675_v58 = vpop.permute.xlu2 %674 }
 0x33c   :  { %v694_v59 = vmul.f32 %v675_v58, %v646_v57 }
 0x33e   :  { %v710_v60 = vsel %vm56_vm1, %v694_v59, 0.0 }
 0x33f   :  { %711 = vadd.xlane.f32.xlu0 %v710_v60 }
 0x343   :  { %v671_v0 = vpop.permute.xlu0 %670 }
 0x344   :  { %v692_v1 = vmul.f32 %v671_v0, %v644_v62 }
 0x346   :  { %v704_v63 = vsel %vm56_vm1, %v692_v1, 0.0 }
 0x347   :  { %705 = vadd.xlane.f32.xlu2 %v704_v63 }
 0x34b   :  { %v673_v4 = vpop.permute.xlu1 %672 }
 0x34c   :  { %v693_v6 = vmul.f32 %v673_v4, %v645_v3 }
 0x34e   :  { %v707_v55 = vsel %vm56_vm1, %v693_v6, 0.0 }
 0x34f   :  { %708 = vadd.xlane.f32.xlu2 %v707_v55 }
 0x353   :  { %v681_v12 = vpop.permute.xlu2 %680 }
 0x354   :  { %v697_v7 = vmul.f32 %v681_v12, %v649_v9 }
 0x356   :  { %v719_v5 = vsel %vm56_vm1, %v697_v7, 0.0 }
 0x357   :  { %720 = vadd.xlane.f32.xlu0 %v719_v5 }
 0x35b   :  { %v677_v15 = vpop.permute.xlu0 %676 }
 0x35c   :  { %v695_v17 = vmul.f32 %v677_v15, %v647_v14 }
 0x35e   :  { %v713_v18 = vsel %vm56_vm1, %v695_v17, 0.0 }
 0x35f   :  { %714 = vadd.xlane.f32.xlu1 %v713_v18 }
 0x363   :  { %v679_v20 = vpop.permute.xlu1 %678 }
 0x364   :  { %v696_v21 = vmul.f32 %v679_v20, %v648_v16 }
 0x366   :  { %v716_v22 = vsel %vm56_vm1, %v696_v21, 0.0  ;;  %vm746_vm1 = vcmask 1044484  }
 0x367   :  { %717 = vadd.xlane.f32.xlu2 %v716_v22 }
 0x3a8   :  { %v703_v23 = vpop.xlane.xlu1 %702 }
 0x3a9   :  { %v733_v30 = vperm.slane %v703_v23, %v731_v24 }
 0x3aa   :  { %v700_v10 = vpop.xlane.xlu0 %699 }
 0x3ab   :  { %v732_v28 = vperm.slane %v700_v10, %v731_v24 }
 0x3ad   :  { %v741_v34 = vsel %vm740_vm5, %v733_v30, %v732_v28 }
 0x3b2   :  { %v712_v26 = vpop.xlane.xlu0 %711 }
 0x3b3   :  { %v736_v37 = vperm.slane %v712_v26, %v731_v24 }
 0x3ba   :  { %v706_v11 = vpop.xlane.xlu2 %705 }
 0x3bb   :  { %v734_v29 = vperm.slane %v706_v11, %v731_v24 }
 0x3bd   :  { %v743_v33 = vsel %vm742_vm3, %v734_v29, %v741_v34 }
 0x3c2   :  { %v709_v27 = vpop.xlane.xlu2 %708 }
 0x3c3   :  { %v735_v31 = vperm.slane %v709_v27, %v731_v24 }
 0x3c5   :  { %v745_v35 = vsel %vm744_vm4, %v735_v31, %v743_v33 }
 0x3c6   :  { %v747_v39 = vsel %vm746_vm1, %v736_v37, %v745_v35 }
 0x3ca   :  { %v721_v54 = vpop.xlane.xlu0 %720 }
 0x3cb   :  { %v739_v41 = vperm.slane %v721_v54, %v731_v24 }
 0x3d2   :  { %v715_v32 = vpop.xlane.xlu1 %714 }
 0x3d3   :  { %v737_v36 = vperm.slane %v715_v32, %v731_v24 }
 0x3d5   :  { %v749_v42 = vsel %vm748_vm6, %v737_v36, %v747_v39 }
 0x3da   :  { %v718_v38 = vpop.xlane.xlu2 %717 }
 0x3db   :  { %v738_v40 = vperm.slane %v718_v38, %v731_v24 }
 0x3dd   :  { %v751_v43 = vsel %vm750_vm7, %v738_v40, %v749_v42 }
 0x3de   :  { %v753_v44 = vsel %vm752_vm8, %v739_v41, %v751_v43 }
 0x3df   :  { %756 = vst.msk [vmem:[#allocation2] sm:$0xff] %vm755_vm9, %v753_v44 }
 0x3e0   :  { %767 = dma.vmem_to_hbm [thread:$0]  %s763_s14, 128, %s765_s17, [#allocation3]  }
 0x3e1   :  { %919 = dma.done.wait [#allocation3], 128  }
 0x3e2   :  { %920 = vsyncadd [#allocation3], 4294967168 }
 0x3e3   :  { %772 = vsyncpa [#allocation3], 1 }

</bundles_post_ra>
